<compile_context>
chip_gen: v7x
topology: tpu7x:2x2x1
jax: 0.10.0
libtpu: 0.0.40
codegen_flags: <defaults>
</compile_context>

<pallas_src>
import jax
import jax.numpy as jnp
from jax.experimental import pallas as pl
from jax.experimental.pallas import tpu as pltpu

EMBED_DIM = 64
HIDDEN_DIM = 128
VOCAB_SIZE = 4      # Vocabulary() with only the 4 special tokens
VOCAB_PAD = 128     # lane-dense padded fc output width
VOCAB_K = 8         # sublane-padded width of the one-hot gather / gi_tok table
BATCH_PAD = 8       # sublane height


def decoder_kernel(onehot_ref,    # VMEM (T, B_pad, VOCAB_K)  one-hot token ids
                   ctx_ref,       # VMEM (B_pad, H)           attention context
                   h0_ref,        # VMEM (B_pad, H)           initial hidden
                   gi_tok_ref,    # VMEM (VOCAB_K, 3H)        embedding @ W_ih[:E]
                   w_ih_c_ref,    # VMEM (H, 3H)              W_ih rows for context
                   w_hh_ref,      # VMEM (H, 3H)
                   b_pre_ref,     # VMEM (1, 3H)              b_ih + [b_hh_r, b_hh_z, 0]
                   b_hn_ref,      # VMEM (1, H)               b_hh_n
                   w_fc_ref,      # VMEM (H, VOCAB_PAD)       zero-padded fc weight
                   b_fc_ref,      # VMEM (1, VOCAB_PAD)
                   logits_ref,    # out  (T, B_pad, VOCAB_PAD)
                   h_out_ref):    # out  (B_pad, H)
    H = HIDDEN_DIM
    T = onehot_ref.shape[0]

    # Step-invariant work, done exactly once per call: context contribution to
    # the input gates with the r/z biases folded in.
    gi_ctx = (jnp.dot(ctx_ref[...], w_ih_c_ref[...],
                      preferred_element_type=jnp.float32) + b_pre_ref[...])

    gi_tok = gi_tok_ref[...]
    w_hh = w_hh_ref[...]
    b_hn = b_hn_ref[...]
    w_fc = w_fc_ref[...]
    b_fc = b_fc_ref[...]

    # Hidden state carried as a kernel-local value; single h_out store at end.
    # T is static and tiny (the nn.Module implies T == 1), so a static Python
    # loop keeps every index static and gives the scheduler full visibility.
    h = h0_ref[...]
    for t in range(T):
        # Token "gather" as a one-hot matmul on the MXU (exact row selection).
        gi = (jnp.dot(onehot_ref[t], gi_tok,
                      preferred_element_type=jnp.float32) + gi_ctx)
        gh = jnp.dot(h, w_hh, preferred_element_type=jnp.float32)

        r = jax.nn.sigmoid(gi[:, 0:H] + gh[:, 0:H])
        z = jax.nn.sigmoid(gi[:, H:2 * H] + gh[:, H:2 * H])
        n = jnp.tanh(gi[:, 2 * H:] + r * (gh[:, 2 * H:] + b_hn))
        h = (1.0 - z) * n + z * h

        logits_ref[t] = (jnp.dot(h, w_fc, preferred_element_type=jnp.float32)
                         + b_fc)

    h_out_ref[...] = h


def make_params(key):
    """Deterministic parameter init mirroring the nn.Module shapes."""
    ks = jax.random.split(key, 7)
    scale = 0.08
    return {
        "embedding": scale * jax.random.normal(ks[0], (VOCAB_SIZE, EMBED_DIM), jnp.float32),
        # PyTorch stores weight_ih_l0 as (3H, E+H); we keep the transposed layout.
        "w_ih_t": scale * jax.random.normal(ks[1], (EMBED_DIM + HIDDEN_DIM, 3 * HIDDEN_DIM), jnp.float32),
        "w_hh_t": scale * jax.random.normal(ks[2], (HIDDEN_DIM, 3 * HIDDEN_DIM), jnp.float32),
        "b_ih": scale * jax.random.normal(ks[3], (1, 3 * HIDDEN_DIM), jnp.float32),
        "b_hh": scale * jax.random.normal(ks[4], (1, 3 * HIDDEN_DIM), jnp.float32),
        "w_fc_t": scale * jax.random.normal(ks[5], (HIDDEN_DIM, VOCAB_SIZE), jnp.float32),
        "b_fc": scale * jax.random.normal(ks[6], (1, VOCAB_SIZE), jnp.float32),
    }


def pack_params(params):
    """One-time weight repack into the kernel layout (hoisted out of decode)."""
    E, H, V = EMBED_DIM, HIDDEN_DIM, VOCAB_SIZE
    # Fold the embedding-side projection: (V, E) @ (E, 3H) -> (V, 3H), padded
    # to VOCAB_K rows so the in-kernel one-hot matmul is sublane-aligned.
    gi_tok = jnp.zeros((VOCAB_K, 3 * H), jnp.float32).at[:V].set(
        params["embedding"] @ params["w_ih_t"][:E])
    b_pre = params["b_ih"] + jnp.concatenate(
        [params["b_hh"][:, :2 * H], jnp.zeros((1, H), jnp.float32)], axis=1)
    w_fc_p = jnp.zeros((H, VOCAB_PAD), jnp.float32).at[:, :V].set(params["w_fc_t"])
    b_fc_p = jnp.zeros((1, VOCAB_PAD), jnp.float32).at[:, :V].set(params["b_fc"])
    return {
        "gi_tok": gi_tok,                   # (VOCAB_K, 3H)
        "w_ih_c": params["w_ih_t"][E:],     # (H, 3H)
        "w_hh": params["w_hh_t"],           # (H, 3H)
        "b_pre": b_pre,                     # (1, 3H)
        "b_hn": params["b_hh"][:, 2 * H:],  # (1, H)
        "w_fc_p": w_fc_p,                   # (H, VOCAB_PAD)
        "b_fc_p": b_fc_p,                   # (1, VOCAB_PAD)
    }


def decoder_forward(packed, x, hidden, context):
    """Matches Decoder.forward semantics; also runs T fused decode steps.

    x:       (B, T) int32 token ids  (the PyTorch module implies T == 1)
    hidden:  (1, B, H) float32
    context: (1, B, H) float32
    returns (output (B, T, V), hidden (1, B, H))
    """
    B, T = x.shape
    H, V = HIDDEN_DIM, VOCAB_SIZE
    B_pad = ((B + BATCH_PAD - 1) // BATCH_PAD) * BATCH_PAD

    # Step-major one-hot tokens, batch-padded to a full sublane tile.
    onehot = jax.nn.one_hot(jnp.asarray(x, jnp.int32).T, VOCAB_K,
                            dtype=jnp.float32)                     # (T, B, VOCAB_K)
    onehot = jnp.pad(onehot, ((0, 0), (0, B_pad - B), (0, 0)))
    ctx = jnp.pad(context[0], ((0, B_pad - B), (0, 0)))            # (B_pad, H)
    h0 = jnp.pad(hidden[0], ((0, B_pad - B), (0, 0)))              # (B_pad, H)

    full2 = lambda i: (0, 0)
    full3 = lambda i: (0, 0, 0)

    logits_p, h_new = pl.pallas_call(
        decoder_kernel,
        out_shape=(
            jax.ShapeDtypeStruct((T, B_pad, VOCAB_PAD), jnp.float32),
            jax.ShapeDtypeStruct((B_pad, H), jnp.float32),
        ),
        grid=(1,),
        in_specs=[
            pl.BlockSpec((T, B_pad, VOCAB_K), full3),   # one-hot tokens
            pl.BlockSpec((B_pad, H), full2),            # ctx
            pl.BlockSpec((B_pad, H), full2),            # h0
            pl.BlockSpec((VOCAB_K, 3 * H), full2),      # gi_tok
            pl.BlockSpec((H, 3 * H), full2),            # w_ih_c
            pl.BlockSpec((H, 3 * H), full2),            # w_hh
            pl.BlockSpec((1, 3 * H), full2),            # b_pre
            pl.BlockSpec((1, H), full2),                # b_hn
            pl.BlockSpec((H, VOCAB_PAD), full2),        # w_fc (padded)
            pl.BlockSpec((1, VOCAB_PAD), full2),        # b_fc (padded)
        ],
        out_specs=(
            pl.BlockSpec((T, B_pad, VOCAB_PAD), full3),
            pl.BlockSpec((B_pad, H), full2),
        ),
        compiler_params=pltpu.CompilerParams(
            dimension_semantics=("arbitrary",)),
    )(onehot, ctx, h0,
      packed["gi_tok"], packed["w_ih_c"], packed["w_hh"],
      packed["b_pre"], packed["b_hn"], packed["w_fc_p"], packed["b_fc_p"])

    output = jnp.transpose(logits_p[:, :B, :V], (1, 0, 2))   # (B, T, V)
    return output, h_new[:B][None]


def decoder_forward_ref(params, x, hidden, context):
    """Pure-JAX reference (PyTorch GRU semantics), one step at a time."""
    B, T = x.shape
    H = HIDDEN_DIM
    emb = params["embedding"][x]      # (B, T, E)
    ctx = context[0]
    h = hidden[0]
    outs = []
    for t in range(T):
        xin = jnp.concatenate([emb[:, t, :], ctx], axis=1)
        gi = xin @ params["w_ih_t"] + params["b_ih"]
        gh = h @ params["w_hh_t"] + params["b_hh"]
        r = jax.nn.sigmoid(gi[:, :H] + gh[:, :H])
        z = jax.nn.sigmoid(gi[:, H:2 * H] + gh[:, H:2 * H])
        n = jnp.tanh(gi[:, 2 * H:] + r * gh[:, 2 * H:])
        h = (1.0 - z) * n + z * h
        outs.append(h @ params["w_fc_t"] + params["b_fc"])
    return jnp.stack(outs, axis=1), h[None, :, :]


if __name__ == "__main__":
    key = jax.random.PRNGKey(0)
    k_par, k_x1, k_x2, k_h, k_c = jax.random.split(key, 5)

    B = 2
    params = make_params(k_par)
    packed = pack_params(params)   # one-time repack: fold emb@W_ih, pad fc, pre-sum biases

    hidden = jax.random.normal(k_h, (1, B, HIDDEN_DIM), jnp.float32)
    context = jax.random.normal(k_c, (1, B, HIDDEN_DIM), jnp.float32)

    # --- single step: exactly the nn.Module forward (seq len must be 1) ---
    x1 = jax.random.randint(k_x1, (B, 1), 0, VOCAB_SIZE, dtype=jnp.int32)
    out, h_new = decoder_forward(packed, x1, hidden, context)
    jax.block_until_ready((out, h_new))
    out_ref, h_ref = decoder_forward_ref(params, x1, hidden, context)
    assert out.shape == (B, 1, VOCAB_SIZE)
    assert h_new.shape == (1, B, HIDDEN_DIM)
    # f32 everywhere; tolerance only covers reassociation from the split matmul
    # and the folded biases.
    assert jnp.allclose(out, out_ref, atol=1e-4, rtol=1e-4)
    assert jnp.allclose(h_new, h_ref, atol=1e-4, rtol=1e-4)

    # --- fused multi-step decode: 8 GRU steps in ONE pallas_call ---
    T = 8
    x8 = jax.random.randint(k_x2, (B, T), 0, VOCAB_SIZE, dtype=jnp.int32)
    out8, h8 = decoder_forward(packed, x8, hidden, context)
    jax.block_until_ready((out8, h8))
    out8_ref, h8_ref = decoder_forward_ref(params, x8, hidden, context)
    assert out8.shape == (B, T, VOCAB_SIZE)
    assert h8.shape == (1, B, HIDDEN_DIM)
    assert jnp.allclose(out8, out8_ref, atol=1e-4, rtol=1e-4)
    assert jnp.allclose(h8, h8_ref, atol=1e-4, rtol=1e-4)

    print("KERNEL_OK")
</pallas_src>

<mosaic_0001>
module attributes {stable_mosaic.version = 11 : i64} {
  func.func @decoder_kernel(%arg0: i32, %arg1: memref<1x8x8xf32, #tpu.memory_space<vmem>>, %arg2: memref<8x128xf32, #tpu.memory_space<vmem>>, %arg3: memref<8x128xf32, #tpu.memory_space<vmem>>, %arg4: memref<8x384xf32, #tpu.memory_space<vmem>>, %arg5: memref<128x384xf32, #tpu.memory_space<vmem>>, %arg6: memref<128x384xf32, #tpu.memory_space<vmem>>, %arg7: memref<1x384xf32, #tpu.memory_space<vmem>>, %arg8: memref<1x128xf32, #tpu.memory_space<vmem>>, %arg9: memref<128x128xf32, #tpu.memory_space<vmem>>, %arg10: memref<1x128xf32, #tpu.memory_space<vmem>>, %arg11: memref<1x8x128xf32, #tpu.memory_space<vmem>>, %arg12: memref<8x128xf32, #tpu.memory_space<vmem>>) attributes {dimension_semantics = [#tpu.dimension_semantics<arbitrary>], iteration_bounds = array<i64: 1>, scalar_prefetch = 0 : i64, scratch_operands = 0 : i64, tpu.core_type = #tpu.core_type<tc>, window_params = [{pipeline_mode = #tpu.pipeline_mode<synchronous>, transform_indices = @transform_0, window_bounds = array<i64: 1, 8, 8>}, {pipeline_mode = #tpu.pipeline_mode<synchronous>, transform_indices = @transform_1, window_bounds = array<i64: 8, 128>}, {pipeline_mode = #tpu.pipeline_mode<synchronous>, transform_indices = @transform_2, window_bounds = array<i64: 8, 128>}, {pipeline_mode = #tpu.pipeline_mode<synchronous>, transform_indices = @transform_3, window_bounds = array<i64: 8, 384>}, {pipeline_mode = #tpu.pipeline_mode<synchronous>, transform_indices = @transform_4, window_bounds = array<i64: 128, 384>}, {pipeline_mode = #tpu.pipeline_mode<synchronous>, transform_indices = @transform_5, window_bounds = array<i64: 128, 384>}, {pipeline_mode = #tpu.pipeline_mode<synchronous>, transform_indices = @transform_6, window_bounds = array<i64: 1, 384>}, {pipeline_mode = #tpu.pipeline_mode<synchronous>, transform_indices = @transform_7, window_bounds = array<i64: 1, 128>}, {pipeline_mode = #tpu.pipeline_mode<synchronous>, transform_indices = @transform_8, window_bounds = array<i64: 128, 128>}, {pipeline_mode = #tpu.pipeline_mode<synchronous>, transform_indices = @transform_9, window_bounds = array<i64: 1, 128>}, {pipeline_mode = #tpu.pipeline_mode<synchronous>, transform_indices = @transform_10, window_bounds = array<i64: 1, 8, 128>}, {pipeline_mode = #tpu.pipeline_mode<synchronous>, transform_indices = @transform_11, window_bounds = array<i64: 8, 128>}]} {
    %c0 = arith.constant 0 : index
    %c0_0 = arith.constant 0 : index
    %0 = vector.load %arg2[%c0, %c0_0] : memref<8x128xf32, #tpu.memory_space<vmem>>, vector<8x128xf32>
    %c0_1 = arith.constant 0 : index
    %c0_2 = arith.constant 0 : index
    %1 = vector.load %arg5[%c0_1, %c0_2] : memref<128x384xf32, #tpu.memory_space<vmem>>, vector<128x384xf32>
    %cst = arith.constant dense<0.000000e+00> : vector<8x384xf32>
    %2 = tpu.matmul %0, %1, %cst {dimension_numbers = #tpu.dot_dimension_numbers<[1], [0], [0], [1], [0, 0, 1, 1], [], []>} : vector<8x128xf32>, vector<128x384xf32>, vector<8x384xf32> -> vector<8x384xf32>
    %c0_3 = arith.constant 0 : index
    %c0_4 = arith.constant 0 : index
    %3 = vector.load %arg7[%c0_3, %c0_4] : memref<1x384xf32, #tpu.memory_space<vmem>>, vector<1x384xf32>
    %4 = vector.broadcast %3 : vector<1x384xf32> to vector<8x384xf32>
    %5 = arith.addf %2, %4 : vector<8x384xf32>
    %c0_5 = arith.constant 0 : index
    %c0_6 = arith.constant 0 : index
    %6 = vector.load %arg4[%c0_5, %c0_6] : memref<8x384xf32, #tpu.memory_space<vmem>>, vector<8x384xf32>
    %c0_7 = arith.constant 0 : index
    %c0_8 = arith.constant 0 : index
    %7 = vector.load %arg6[%c0_7, %c0_8] : memref<128x384xf32, #tpu.memory_space<vmem>>, vector<128x384xf32>
    %c0_9 = arith.constant 0 : index
    %c0_10 = arith.constant 0 : index
    %8 = vector.load %arg8[%c0_9, %c0_10] : memref<1x128xf32, #tpu.memory_space<vmem>>, vector<1x128xf32>
    %c0_11 = arith.constant 0 : index
    %c0_12 = arith.constant 0 : index
    %9 = vector.load %arg9[%c0_11, %c0_12] : memref<128x128xf32, #tpu.memory_space<vmem>>, vector<128x128xf32>
    %c0_13 = arith.constant 0 : index
    %c0_14 = arith.constant 0 : index
    %10 = vector.load %arg10[%c0_13, %c0_14] : memref<1x128xf32, #tpu.memory_space<vmem>>, vector<1x128xf32>
    %c0_15 = arith.constant 0 : index
    %c0_16 = arith.constant 0 : index
    %11 = vector.load %arg3[%c0_15, %c0_16] : memref<8x128xf32, #tpu.memory_space<vmem>>, vector<8x128xf32>
    %c0_17 = arith.constant 0 : index
    %c0_18 = arith.constant 0 : index
    %c0_19 = arith.constant 0 : index
    %12 = vector.load %arg1[%c0_17, %c0_18, %c0_19] : memref<1x8x8xf32, #tpu.memory_space<vmem>>, vector<1x8x8xf32>
    %13 = vector.shape_cast %12 : vector<1x8x8xf32> to vector<8x8xf32>
    %cst_20 = arith.constant dense<0.000000e+00> : vector<8x384xf32>
    %14 = tpu.matmul %13, %6, %cst_20 {dimension_numbers = #tpu.dot_dimension_numbers<[1], [0], [0], [1], [0, 0, 1, 1], [], []>} : vector<8x8xf32>, vector<8x384xf32>, vector<8x384xf32> -> vector<8x384xf32>
    %15 = arith.addf %14, %5 : vector<8x384xf32>
    %cst_21 = arith.constant dense<0.000000e+00> : vector<8x384xf32>
    %16 = tpu.matmul %11, %7, %cst_21 {dimension_numbers = #tpu.dot_dimension_numbers<[1], [0], [0], [1], [0, 0, 1, 1], [], []>} : vector<8x128xf32>, vector<128x384xf32>, vector<8x384xf32> -> vector<8x384xf32>
    %17 = vector.extract_strided_slice %15 {offsets = [0, 0], sizes = [8, 128], strides = [1, 1]} : vector<8x384xf32> to vector<8x128xf32>
    %18 = vector.extract_strided_slice %16 {offsets = [0, 0], sizes = [8, 128], strides = [1, 1]} : vector<8x384xf32> to vector<8x128xf32>
    %19 = arith.addf %17, %18 : vector<8x128xf32>
    %20 = arith.negf %19 : vector<8x128xf32>
    %21 = math.exp %20 : vector<8x128xf32>
    %cst_22 = arith.constant 1.000000e+00 : f32
    %22 = vector.broadcast %cst_22 : f32 to vector<8x128xf32>
    %23 = arith.addf %22, %21 : vector<8x128xf32>
    %24 = arith.divf %22, %23 : vector<8x128xf32>
    %25 = vector.extract_strided_slice %15 {offsets = [0, 128], sizes = [8, 128], strides = [1, 1]} : vector<8x384xf32> to vector<8x128xf32>
    %26 = vector.extract_strided_slice %16 {offsets = [0, 128], sizes = [8, 128], strides = [1, 1]} : vector<8x384xf32> to vector<8x128xf32>
    %27 = arith.addf %25, %26 : vector<8x128xf32>
    %28 = arith.negf %27 : vector<8x128xf32>
    %29 = math.exp %28 : vector<8x128xf32>
    %cst_23 = arith.constant 1.000000e+00 : f32
    %30 = vector.broadcast %cst_23 : f32 to vector<8x128xf32>
    %31 = arith.addf %30, %29 : vector<8x128xf32>
    %32 = arith.divf %30, %31 : vector<8x128xf32>
    %33 = vector.extract_strided_slice %15 {offsets = [0, 256], sizes = [8, 128], strides = [1, 1]} : vector<8x384xf32> to vector<8x128xf32>
    %34 = vector.extract_strided_slice %16 {offsets = [0, 256], sizes = [8, 128], strides = [1, 1]} : vector<8x384xf32> to vector<8x128xf32>
    %35 = vector.broadcast %8 : vector<1x128xf32> to vector<8x128xf32>
    %36 = arith.addf %34, %35 : vector<8x128xf32>
    %37 = arith.mulf %24, %36 : vector<8x128xf32>
    %38 = arith.addf %33, %37 : vector<8x128xf32>
    %39 = math.tanh %38 : vector<8x128xf32>
    %cst_24 = arith.constant 1.000000e+00 : f32
    %40 = vector.broadcast %cst_24 : f32 to vector<8x128xf32>
    %41 = arith.subf %40, %32 : vector<8x128xf32>
    %42 = arith.mulf %41, %39 : vector<8x128xf32>
    %43 = arith.mulf %32, %11 : vector<8x128xf32>
    %44 = arith.addf %42, %43 : vector<8x128xf32>
    %cst_25 = arith.constant dense<0.000000e+00> : vector<8x128xf32>
    %45 = tpu.matmul %44, %9, %cst_25 {dimension_numbers = #tpu.dot_dimension_numbers<[1], [0], [0], [1], [0, 0, 1, 1], [], []>} : vector<8x128xf32>, vector<128x128xf32>, vector<8x128xf32> -> vector<8x128xf32>
    %46 = vector.broadcast %10 : vector<1x128xf32> to vector<8x128xf32>
    %47 = arith.addf %45, %46 : vector<8x128xf32>
    %c0_26 = arith.constant 0 : index
    %c0_27 = arith.constant 0 : index
    %c0_28 = arith.constant 0 : index
    %48 = vector.load %arg11[%c0_26, %c0_27, %c0_28] : memref<1x8x128xf32, #tpu.memory_space<vmem>>, vector<1x8x128xf32>
    %49 = vector.shape_cast %48 : vector<1x8x128xf32> to vector<8x128xf32>
    %50 = vector.shape_cast %47 : vector<8x128xf32> to vector<1x8x128xf32>
    tpu.vector_store %arg11[%c0_26, %c0_27, %c0_28], %50 {strides = array<i32>} : memref<1x8x128xf32, #tpu.memory_space<vmem>>, vector<1x8x128xf32>,
    %c0_29 = arith.constant 0 : index
    %c0_30 = arith.constant 0 : index
    %51 = vector.load %arg12[%c0_29, %c0_30] : memref<8x128xf32, #tpu.memory_space<vmem>>, vector<8x128xf32>
    tpu.vector_store %arg12[%c0_29, %c0_30], %44 {strides = array<i32>} : memref<8x128xf32, #tpu.memory_space<vmem>>, vector<8x128xf32>,
    return
  }
  func.func @transform_0(%arg0: i32) -> (i32, i32, i32) {
    %c0_i32 = arith.constant 0 : i32
    %c0_i32_0 = arith.constant 0 : i32
    %c0_i32_1 = arith.constant 0 : i32
    %c0_i32_2 = arith.constant 0 : i32
    return %c0_i32, %c0_i32_0, %c0_i32_1 : i32, i32, i32
  }
  func.func @transform_1(%arg0: i32) -> (i32, i32) {
    %c0_i32 = arith.constant 0 : i32
    %c0_i32_0 = arith.constant 0 : i32
    %c0_i32_1 = arith.constant 0 : i32
    return %c0_i32, %c0_i32_0 : i32, i32
  }
  func.func @transform_2(%arg0: i32) -> (i32, i32) {
    %c0_i32 = arith.constant 0 : i32
    %c0_i32_0 = arith.constant 0 : i32
    %c0_i32_1 = arith.constant 0 : i32
    return %c0_i32, %c0_i32_0 : i32, i32
  }
  func.func @transform_3(%arg0: i32) -> (i32, i32) {
    %c0_i32 = arith.constant 0 : i32
    %c0_i32_0 = arith.constant 0 : i32
    %c0_i32_1 = arith.constant 0 : i32
    return %c0_i32, %c0_i32_0 : i32, i32
  }
  func.func @transform_4(%arg0: i32) -> (i32, i32) {
    %c0_i32 = arith.constant 0 : i32
    %c0_i32_0 = arith.constant 0 : i32
    %c0_i32_1 = arith.constant 0 : i32
    return %c0_i32, %c0_i32_0 : i32, i32
  }
  func.func @transform_5(%arg0: i32) -> (i32, i32) {
    %c0_i32 = arith.constant 0 : i32
    %c0_i32_0 = arith.constant 0 : i32
    %c0_i32_1 = arith.constant 0 : i32
    return %c0_i32, %c0_i32_0 : i32, i32
  }
  func.func @transform_6(%arg0: i32) -> (i32, i32) {
    %c0_i32 = arith.constant 0 : i32
    %c0_i32_0 = arith.constant 0 : i32
    %c0_i32_1 = arith.constant 0 : i32
    return %c0_i32, %c0_i32_0 : i32, i32
  }
  func.func @transform_7(%arg0: i32) -> (i32, i32) {
    %c0_i32 = arith.constant 0 : i32
    %c0_i32_0 = arith.constant 0 : i32
    %c0_i32_1 = arith.constant 0 : i32
    return %c0_i32, %c0_i32_0 : i32, i32
  }
  func.func @transform_8(%arg0: i32) -> (i32, i32) {
    %c0_i32 = arith.constant 0 : i32
    %c0_i32_0 = arith.constant 0 : i32
    %c0_i32_1 = arith.constant 0 : i32
    return %c0_i32, %c0_i32_0 : i32, i32
  }
  func.func @transform_9(%arg0: i32) -> (i32, i32) {
    %c0_i32 = arith.constant 0 : i32
    %c0_i32_0 = arith.constant 0 : i32
    %c0_i32_1 = arith.constant 0 : i32
    return %c0_i32, %c0_i32_0 : i32, i32
  }
  func.func @transform_10(%arg0: i32) -> (i32, i32, i32) {
    %c0_i32 = arith.constant 0 : i32
    %c0_i32_0 = arith.constant 0 : i32
    %c0_i32_1 = arith.constant 0 : i32
    %c0_i32_2 = arith.constant 0 : i32
    return %c0_i32, %c0_i32_0, %c0_i32_1 : i32, i32, i32
  }
  func.func @transform_11(%arg0: i32) -> (i32, i32) {
    %c0_i32 = arith.constant 0 : i32
    %c0_i32_0 = arith.constant 0 : i32
    %c0_i32_1 = arith.constant 0 : i32
    return %c0_i32, %c0_i32_0 : i32, i32
  }
}

</mosaic_0001>

<bundles_post_ra>
// kernel: tpu_custom_call.1
= control target key start
LH: loop header
LB: loop body
LE: loop exit
PB: predicated region body
PF: predicated region fallthrough
CT: control target
= control target key end

     0   :  { %17 = vsyncpa [#allocation3], 0  ;;  %s1624_s0 = inlined_call_operand.hbm [shape: f32[1,8,8], index: 0, kind: input, shape index: {}]   ;;  %s1625_s1 = inlined_call_operand.hbm [shape: f32[8,128], index: 1, kind: input, shape index: {}]   ;;  %s1626_s2 = inlined_call_operand.hbm [shape: f32[8,128], index: 2, kind: input, shape index: {}]   ;;  %s1627_s3 = inlined_call_operand.hbm [shape: f32[8,384], index: 3, kind: input, shape index: {}]   ;;  %s1628_s4 = inlined_call_operand.hbm [shape: f32[128,384], index: 4, kind: input, shape index: {}]   ;;  %s1629_s5 = inlined_call_operand.hbm [shape: f32[128,384], index: 5, kind: input, shape index: {}]   ;;  %s1630_s6 = inlined_call_operand.vmem [shape: f32[1,384], index: 6, kind: input, shape index: {}]   ;;  %s1631_s7 = inlined_call_operand.vmem [shape: f32[1,128], index: 7, kind: input, shape index: {}]   ;;  %s1632_s8 = inlined_call_operand.hbm [shape: f32[128,128], index: 8, kind: input, shape index: {}]   ;;  %s1633_s9 = inlined_call_operand.vmem [shape: f32[1,128], index: 9, kind: input, shape index: {}]   ;;  %s1634_s10 = inlined_call_operand.hbm [shape: f32[1,8,128], index: 10, kind: output, shape index: {0}]   ;;  %s1635_s11 = inlined_call_operand.hbm [shape: f32[8,128], index: 11, kind: output, shape index: {1}]  }
   0x1   :  { %18 = vsyncpa [#allocation6], 0 }
   0x2   :  { %19 = vsyncpa [#allocation9], 0 }
   0x3   :  { %20 = vsyncpa [#allocation12], 0 }
   0x4   :  { %21 = vsyncpa [#allocation4], 0 }
   0x5   :  { %22 = vsyncpa [#allocation16], 0  ;;  %s1375_s17 = smov [#allocation5]   ;;  %s1376_s19 = smov [#allocation8]  }
   0x6   :  { %s39_s18 = sshll.u32 %s1375_s17, 4  ;;  %s59_s20 = sshll.u32 %s1376_s19, 4  ;;  %s40_s18 = int_to_ptr.vmem [resolvable:$true] %s39_s18  ;;  %s60_s20 = int_to_ptr.vmem [resolvable:$true] %s59_s20 }
   0x7   :  { %s1165_s23 = scalar_lea.hbm %s1625_s1, 128 }
   0x8   :  { %p1166_p0 = scmp.ne.s32.totalorder %s1625_s1, %s1165_s23  ;;  %p1169_p1 = scmp.lt.u32.totalorder %s1165_s23, %s1625_s1 }
   0xa   :  { %p1171_p2 = pnand %p1169_p1, %p1166_p0 }
   0xc   :  { %1174 = shalt.err (!%p1171_p2)
}
   0xd   :  { %s1175_s28 = scalar_lea.vmem %s40_s18, 128  ;;  %p1180_p4 = scmp.lt.s32.totalorder %s40_s18, %s40_s18 }
   0xe   :  { %p1176_p3 = scmp.ne.s32.totalorder %s40_s18, %s1175_s28  ;;  %p1181_p5 = scmp.lt.s32.totalorder %s1175_s28, %s1175_s28 }
  0x10   :  { %p1182_p6 = por %p1181_p5, %p1180_p4 }
  0x12   :  { %p1183_p7 = pnand %p1182_p6, %p1176_p3 }
  0x14   :  { %1186 = shalt.err (!%p1183_p7)
}
  0x15   :  { %42 = dma.hbm_to_vmem [thread:$0]  %s1625_s1, 128, %s40_s18, [#allocation6]  }
  0x16   :  { %s1187_s14 = scalar_lea.hbm %s1627_s3, 384 }
  0x17   :  { %p1188_p8 = scmp.ne.s32.totalorder %s1627_s3, %s1187_s14  ;;  %p1191_p9 = scmp.lt.u32.totalorder %s1187_s14, %s1627_s3 }
  0x19   :  { %p1193_p10 = pnand %p1191_p9, %p1188_p8 }
  0x1b   :  { %1196 = shalt.err (!%p1193_p10)
}
  0x1c   :  { %s1197_s21 = scalar_lea.vmem %s60_s20, 384  ;;  %p1202_p12 = scmp.lt.s32.totalorder %s60_s20, %s60_s20 }
  0x1d   :  { %p1198_p11 = scmp.ne.s32.totalorder %s60_s20, %s1197_s21  ;;  %p1203_p13 = scmp.lt.s32.totalorder %s1197_s21, %s1197_s21 }
  0x1f   :  { %p1204_p0 = por %p1203_p13, %p1202_p12 }
  0x21   :  { %p1205_p1 = pnand %p1204_p0, %p1198_p11 }
  0x23   :  { %1208 = shalt.err (!%p1205_p1)
}
  0x24   :  { %62 = dma.hbm_to_vmem [thread:$0]  %s1627_s3, 384, %s60_s20, [#allocation9]  }
  0x25   :  { %s1377_s22 = smov [#allocation11]   ;;  %s1378_s24 = smov [#allocation2]  }
  0x26   :  { %s80_s23 = sshll.u32 %s1377_s22, 4  ;;  %s29_s25 = sshll.u32 %s1378_s24, 4  ;;  %s81_s23 = int_to_ptr.vmem [resolvable:$true] %s80_s23  ;;  %s30_s25 = int_to_ptr.vmem [resolvable:$true] %s29_s25 }
  0x27   :  { %s1209_s28 = scalar_lea.hbm %s1629_s5, 6144 }
  0x28   :  { %p1210_p2 = scmp.ne.s32.totalorder %s1629_s5, %s1209_s28  ;;  %p1213_p3 = scmp.lt.u32.totalorder %s1209_s28, %s1629_s5 }
  0x2a   :  { %p1215_p4 = pnand %p1213_p3, %p1210_p2 }
  0x2c   :  { %1218 = shalt.err (!%p1215_p4)
}
  0x2d   :  { %s1219_s3 = scalar_lea.vmem %s81_s23, 6144  ;;  %p1224_p6 = scmp.lt.s32.totalorder %s81_s23, %s81_s23 }
  0x2e   :  { %p1220_p5 = scmp.ne.s32.totalorder %s81_s23, %s1219_s3  ;;  %p1225_p7 = scmp.lt.s32.totalorder %s1219_s3, %s1219_s3 }
  0x30   :  { %p1226_p8 = por %p1225_p7, %p1224_p6 }
  0x32   :  { %p1227_p9 = pnand %p1226_p8, %p1220_p5 }
  0x34   :  { %1230 = shalt.err (!%p1227_p9)
}
  0x35   :  { %s1379_s20 = smov 384   ;;  %s1380_s14 = smov 24  }
  0x36   :  { %86 = dma.hbm_to_vmem [thread:$0]  %s1629_s5, 6144, %s81_s23, [#allocation12], %s1379_s20, %s1379_s20, %s1380_s14  }
  0x37   :  { %s1231_s21 = scalar_lea.hbm %s1624_s0, 128 }
  0x38   :  { %p1232_p10 = scmp.ne.s32.totalorder %s1624_s0, %s1231_s21  ;;  %p1235_p11 = scmp.lt.u32.totalorder %s1231_s21, %s1624_s0 }
  0x3a   :  { %p1237_p12 = pnand %p1235_p11, %p1232_p10 }
  0x3c   :  { %1240 = shalt.err (!%p1237_p12)
}
  0x3d   :  { %s1241_s26 = scalar_lea.vmem %s30_s25, 128  ;;  %p1246_p0 = scmp.lt.s32.totalorder %s30_s25, %s30_s25 }
  0x3e   :  { %p1242_p13 = scmp.ne.s32.totalorder %s30_s25, %s1241_s26  ;;  %p1247_p1 = scmp.lt.s32.totalorder %s1241_s26, %s1241_s26 }
  0x40   :  { %p1248_p2 = por %p1247_p1, %p1246_p0 }
  0x42   :  { %p1249_p3 = pnand %p1248_p2, %p1242_p13 }
  0x44   :  { %1252 = shalt.err (!%p1249_p3)
}
  0x45   :  { %32 = dma.hbm_to_vmem [thread:$0]  %s1624_s0, 128, %s30_s25, [#allocation3]  }
  0x46   :  { %s1381_s27 = smov [#allocation7]   ;;  %s1382_s29 = smov [#allocation10]  }
  0x47   :  { %s49_s28 = sshll.u32 %s1381_s27, 4  ;;  %s68_s30 = sshll.u32 %s1382_s29, 4  ;;  %s50_s28 = int_to_ptr.vmem [resolvable:$true] %s49_s28  ;;  %s1502_s30 = int_to_ptr.vmem [resolvable:$true] %s68_s30 }
  0x48   :  { %s1253_s3 = scalar_lea.hbm %s1626_s2, 128 }
  0x49   :  { %p1254_p4 = scmp.ne.s32.totalorder %s1626_s2, %s1253_s3  ;;  %p1257_p5 = scmp.lt.u32.totalorder %s1253_s3, %s1626_s2 }
  0x4b   :  { %p1259_p6 = pnand %p1257_p5, %p1254_p4 }
  0x4d   :  { %1262 = shalt.err (!%p1259_p6)
}
  0x4e   :  { %s1263_s0 = scalar_lea.vmem %s50_s28, 128  ;;  %p1268_p8 = scmp.lt.s32.totalorder %s50_s28, %s50_s28 }
  0x4f   :  { %p1264_p7 = scmp.ne.s32.totalorder %s50_s28, %s1263_s0  ;;  %p1269_p9 = scmp.lt.s32.totalorder %s1263_s0, %s1263_s0 }
  0x51   :  { %p1270_p10 = por %p1269_p9, %p1268_p8 }
  0x53   :  { %p1271_p11 = pnand %p1270_p10, %p1264_p7 }
  0x55   :  { %1274 = shalt.err (!%p1271_p11)
}
  0x56   :  { %52 = dma.hbm_to_vmem [thread:$0]  %s1626_s2, 128, %s50_s28, [#allocation6]  }
  0x57   :  { %s1275_s22 = scalar_lea.hbm %s1628_s4, 6144 }
  0x58   :  { %p1276_p12 = scmp.ne.s32.totalorder %s1628_s4, %s1275_s22  ;;  %p1279_p13 = scmp.lt.u32.totalorder %s1275_s22, %s1628_s4 }
  0x5a   :  { %p1281_p0 = pnand %p1279_p13, %p1276_p12 }
  0x5c   :  { %1284 = shalt.err (!%p1281_p0)
}
  0x5d   :  { %s1285_s27 = scalar_lea.vmem %s1502_s30, 6144  ;;  %p1290_p2 = scmp.lt.s32.totalorder %s1502_s30, %s1502_s30 }
  0x5e   :  { %p1286_p1 = scmp.ne.s32.totalorder %s1502_s30, %s1285_s27  ;;  %p1291_p3 = scmp.lt.s32.totalorder %s1285_s27, %s1285_s27 }
  0x60   :  { %p1292_p4 = por %p1291_p3, %p1290_p2 }
  0x62   :  { %p1293_p5 = pnand %p1292_p4, %p1286_p1 }
  0x64   :  { %1296 = shalt.err (!%p1293_p5)
}
  0x65   :  { %74 = dma.hbm_to_vmem [thread:$0]  %s1628_s4, 6144, %s1502_s30, [#allocation9], %s1379_s20, %s1379_s20, %s1380_s14  }
  0x66   :  { %s1383_s29 = smov [#allocation13]   ;;  %s1297_s15 = scalar_lea.hbm %s1632_s8, 2048 }
  0x67   :  { %s96_s12 = sshll.u32 %s1383_s29, 4  ;;  %p1298_p6 = scmp.ne.s32.totalorder %s1632_s8, %s1297_s15  ;;  %s97_s12 = int_to_ptr.vmem [resolvable:$true] %s96_s12 }
  0x68   :  { %p1301_p7 = scmp.lt.u32.totalorder %s1297_s15, %s1632_s8 }
  0x6a   :  { %p1303_p8 = pnand %p1301_p7, %p1298_p6 }
  0x6c   :  { %1306 = shalt.err (!%p1303_p8)
}
  0x6d   :  { %s1307_s25 = scalar_lea.vmem %s97_s12, 2048  ;;  %p1312_p10 = scmp.lt.s32.totalorder %s97_s12, %s97_s12 }
  0x6e   :  { %p1308_p9 = scmp.ne.s32.totalorder %s97_s12, %s1307_s25  ;;  %p1313_p11 = scmp.lt.s32.totalorder %s1307_s25, %s1307_s25 }
  0x70   :  { %p1314_p12 = por %p1313_p11, %p1312_p10 }
  0x72   :  { %p1315_p13 = pnand %p1314_p12, %p1308_p9 }
  0x74   :  { %1318 = shalt.err (!%p1315_p13)
}
  0x75   :  { %s1384_s4 = smov 128   ;;  %s1385_s20 = smov 8  }
  0x76   :  { %102 = dma.hbm_to_vmem [thread:$0]  %s1632_s8, 2048, %s97_s12, [#allocation12], %s1384_s4, %s1384_s4, %s1385_s20  }
  0x77   :  { %1363 = dma.done.wait [#allocation3], 128  }
  0x78   :  { %1364 = vsyncadd [#allocation3], 4294967168 }
  0x79   :  { %1365 = dma.done.wait [#allocation6], 256  }
  0x7a   :  { %1366 = vsyncadd [#allocation6], 4294967040 }
  0x7b   :  { %1367 = dma.done.wait [#allocation9], 6528  }
  0x7c   :  { %1368 = vsyncadd [#allocation9], 4294960768 }
  0x7d   :  { %1369 = dma.done.wait [#allocation12], 8192  }
  0x7e   :  { %1370 = vsyncadd [#allocation12], 4294959104  ;;  %v1386_v0 = vmov 0.0|0.0   ;;  %vm1387_vm0 = vmmov 0   ;;  %v1388_v1 = vmov 0.0   ;;  %v128_v2 = vld [vmem:[#allocation10 + $0x8] sm:$0xff] }
  0x7f   :  { %1029 = vmatprep.subr.bf16.mxu1 %v1386_v0  ;;  %919 = vmatprep.mubr.msk.f32.mxu1 %vm1387_vm0, %v1388_v1  ;;  %v131_v3 = vld [vmem:[#allocation10 + $0x20] sm:$0xff]  ;;  %v129_v4 = vld [vmem:[#allocation10 + $0x10] sm:$0xff]  ;;  %v132_v6 = vld [vmem:[#allocation10 + $0x28] sm:$0xff]  ;;  %vm404_vm1 = vcmask 64512   ;;  %s1389_s18 = smov [#allocation15]  }
  0x80   :  { %256 = vmatprep.mubr.f32.mxu0 %v1388_v1  ;;  %v997_v5 = vpack.c.bf16 %v131_v3, %v128_v2  ;;  %v127_v7 = vld [vmem:[#allocation10] sm:$0xff]  ;;  %v130_v8 = vld [vmem:[#allocation10 + $0x18] sm:$0xff]  ;;  %v1030_v9 = vpack.c.bf16 %v132_v6, %v129_v4  ;;  %v137_v12 = vld [vmem:[#allocation10 + $0x50] sm:$0xff]  ;;  %s812_s22 = sshll.u32 %s1389_s18, 4  ;;  %s813_s22 = int_to_ptr.vmem [resolvable:$true] %s812_s22 }
  0x81   :  { %v999_v10 = vpack.c.bf16 %v130_v8, %v127_v7  ;;  %v134_v11 = vld [vmem:[#allocation10 + $0x38] sm:$0xff]  ;;  %v135_v13 = vld [vmem:[#allocation10 + $0x40] sm:$0xff]  ;;  %v133_v16 = vld [vmem:[#allocation10 + $0x30] sm:$0xff]  ;;  %p1324_p1 = scmp.lt.s32.totalorder %s813_s22, %s813_s22 }
  0x82   :  { %998 = vmatprep.subr.bf16.mxu0 %v997_v5  ;;  %v1001_v14 = vpack.c.bf16 %v137_v12, %v134_v11  ;;  %v138_v15 = vld [vmem:[#allocation10 + $0x58] sm:$0xff]  ;;  %v136_v17 = vld [vmem:[#allocation10 + $0x48] sm:$0xff]  ;;  %1031 = vmatpush3.bf16.msra.mxu1 %v1030_v9  ;;  %v143_v21 = vld [vmem:[#allocation10 + $0x80] sm:$0xff] }
  0x83   :  { %1000 = vmatpush1.bf16.msra.mxu0 %v999_v10  ;;  %v1033_v18 = vpack.c.bf16 %v138_v15, %v135_v13  ;;  %v1003_v19 = vpack.c.bf16 %v136_v17, %v133_v16  ;;  %v140_v20 = vld [vmem:[#allocation10 + $0x68] sm:$0xff]  ;;  %v141_v22 = vld [vmem:[#allocation10 + $0x70] sm:$0xff]  ;;  %1032 = vmatprep.subr.bf16.mxu1 %v1386_v0  ;;  %v139_v25 = vld [vmem:[#allocation10 + $0x60] sm:$0xff] }
  0x84   :  { %1002 = vmatprep.subr.bf16.mxu0 %v1001_v14  ;;  %v1005_v23 = vpack.c.bf16 %v143_v21, %v140_v20  ;;  %v144_v24 = vld [vmem:[#allocation10 + $0x88] sm:$0xff]  ;;  %v142_v26 = vld [vmem:[#allocation10 + $0x78] sm:$0xff]  ;;  %v149_v28 = vld [vmem:[#allocation10 + $0xb0] sm:$0xff] }
  0x85   :  { %v146_v27 = vld [vmem:[#allocation10 + $0x98] sm:$0xff]  ;;  %v1036_v29 = vpack.c.bf16 %v144_v24, %v141_v22  ;;  %v1007_v30 = vpack.c.bf16 %v142_v26, %v139_v25  ;;  %v147_v31 = vld [vmem:[#allocation10 + $0xa0] sm:$0xff]  ;;  %v145_v34 = vld [vmem:[#allocation10 + $0x90] sm:$0xff] }
  0x86   :  { %1034 = vmatpush3.bf16.msra.mxu1 %v1033_v18  ;;  %v1009_v32 = vpack.c.bf16 %v149_v28, %v146_v27  ;;  %v150_v33 = vld [vmem:[#allocation10 + $0xb8] sm:$0xff]  ;;  %v148_v35 = vld [vmem:[#allocation10 + $0xa8] sm:$0xff]  ;;  %v155_v37 = vld [vmem:[#allocation10 + $0xe0] sm:$0xff] }
  0x87   :  { %1004 = vmatpush1.bf16.msra.mxu0 %v1003_v19  ;;  %1035 = vmatprep.subr.bf16.mxu1 %v1386_v0  ;;  %v152_v36 = vld [vmem:[#allocation10 + $0xc8] sm:$0xff]  ;;  %v1039_v38 = vpack.c.bf16 %v150_v33, %v147_v31  ;;  %v1011_v39 = vpack.c.bf16 %v148_v35, %v145_v34  ;;  %v153_v40 = vld [vmem:[#allocation10 + $0xd0] sm:$0xff]  ;;  %v151_v43 = vld [vmem:[#allocation10 + $0xc0] sm:$0xff] }
  0x88   :  { %1006 = vmatprep.subr.bf16.mxu0 %v1005_v23  ;;  %v1013_v41 = vpack.c.bf16 %v155_v37, %v152_v36  ;;  %v156_v42 = vld [vmem:[#allocation10 + $0xe8] sm:$0xff]  ;;  %v154_v44 = vld [vmem:[#allocation10 + $0xd8] sm:$0xff]  ;;  %v161_v46 = vld [vmem:[#allocation10 + $0x110] sm:$0xff] }
  0x89   :  { %v158_v45 = vld [vmem:[#allocation10 + $0xf8] sm:$0xff]  ;;  %v1042_v47 = vpack.c.bf16 %v156_v42, %v153_v40  ;;  %v1015_v48 = vpack.c.bf16 %v154_v44, %v151_v43  ;;  %v159_v49 = vld [vmem:[#allocation10 + $0x100] sm:$0xff]  ;;  %v157_v52 = vld [vmem:[#allocation10 + $0xf0] sm:$0xff] }
  0x8a   :  { %1037 = vmatpush3.bf16.msra.mxu1 %v1036_v29  ;;  %v1017_v50 = vpack.c.bf16 %v161_v46, %v158_v45  ;;  %v162_v51 = vld [vmem:[#allocation10 + $0x118] sm:$0xff]  ;;  %v160_v53 = vld [vmem:[#allocation10 + $0x108] sm:$0xff]  ;;  %v167_v55 = vld [vmem:[#allocation10 + $0x140] sm:$0xff] }
  0x8b   :  { %1008 = vmatpush1.bf16.msra.mxu0 %v1007_v30  ;;  %1038 = vmatprep.subr.bf16.mxu1 %v1386_v0  ;;  %v164_v54 = vld [vmem:[#allocation10 + $0x128] sm:$0xff]  ;;  %v1045_v56 = vpack.c.bf16 %v162_v51, %v159_v49  ;;  %v1019_v57 = vpack.c.bf16 %v160_v53, %v157_v52  ;;  %v165_v58 = vld [vmem:[#allocation10 + $0x130] sm:$0xff]  ;;  %v163_v61 = vld [vmem:[#allocation10 + $0x120] sm:$0xff] }
  0x8c   :  { %1010 = vmatprep.subr.bf16.mxu0 %v1009_v32  ;;  %v1021_v59 = vpack.c.bf16 %v167_v55, %v164_v54  ;;  %v168_v60 = vld [vmem:[#allocation10 + $0x148] sm:$0xff]  ;;  %v166_v62 = vld [vmem:[#allocation10 + $0x138] sm:$0xff]  ;;  %v173_v2 = vld [vmem:[#allocation10 + $0x170] sm:$0xff] }
  0x8d   :  { %v170_v63 = vld [vmem:[#allocation10 + $0x158] sm:$0xff]  ;;  %v1048_v3 = vpack.c.bf16 %v168_v60, %v165_v58  ;;  %v1023_v4 = vpack.c.bf16 %v166_v62, %v163_v61  ;;  %v171_v5 = vld [vmem:[#allocation10 + $0x160] sm:$0xff]  ;;  %v169_v8 = vld [vmem:[#allocation10 + $0x150] sm:$0xff] }
  0x8e   :  { %1040 = vmatpush3.bf16.msra.mxu1 %v1039_v38  ;;  %v1025_v6 = vpack.c.bf16 %v173_v2, %v170_v63  ;;  %v174_v7 = vld [vmem:[#allocation10 + $0x178] sm:$0xff]  ;;  %v172_v9 = vld [vmem:[#allocation10 + $0x168] sm:$0xff]  ;;  %v340_v11 = vld [vmem:[#allocation11 + $0x20] sm:$0xff] }
  0x8f   :  { %1012 = vmatpush1.bf16.msra.mxu0 %v1011_v39  ;;  %1041 = vmatprep.subr.bf16.mxu1 %v1386_v0  ;;  %v337_v10 = vld [vmem:[#allocation11 + $0x8] sm:$0xff]  ;;  %v1051_v12 = vpack.c.bf16 %v174_v7, %v171_v5  ;;  %v1027_v13 = vpack.c.bf16 %v172_v9, %v169_v8  ;;  %v336_v15 = vld [vmem:[#allocation11] sm:$0xff]  ;;  %v339_v16 = vld [vmem:[#allocation11 + $0x18] sm:$0xff] }
  0x90   :  { %1014 = vmatprep.subr.bf16.mxu0 %v1013_v41  ;;  %v1053_v14 = vpack.c.bf16 %v340_v11, %v337_v10  ;;  %v334_v17 = vld [vmem:[#allocation8 + $0x8] sm:$0xff]  ;;  %v343_v18 = vld [vmem:[#allocation11 + $0x38] sm:$0xff]  ;;  %v1055_v21 = vpack.c.bf16 %v339_v16, %v336_v15  ;;  %v333_v22 = vld [vmem:[#allocation8] sm:$0xff] }
  0x91   :  { %v346_v19 = vld [vmem:[#allocation11 + $0x50] sm:$0xff]  ;;  %v126_v20 = vld [vmem:[#allocation5] sm:$0xff]  ;;  %v345_v25 = vld [vmem:[#allocation11 + $0x48] sm:$0xff] }
  0x92   :  { %1043 = vmatpush3.bf16.msra.mxu1 %v1042_v47  ;;  %v1057_v23 = vpack.c.bf16 %v346_v19, %v343_v18  ;;  %v342_v24 = vld [vmem:[#allocation11 + $0x30] sm:$0xff]  ;;  %v349_v26 = vld [vmem:[#allocation11 + $0x68] sm:$0xff]  ;;  %v352_v27 = vld [vmem:[#allocation11 + $0x80] sm:$0xff] }
  0x93   :  { %1016 = vmatpush1.bf16.msra.mxu0 %v1015_v48  ;;  %1044 = vmatprep.subr.bf16.mxu1 %v1386_v0  ;;  %v403_v28 = vld [vmem:[#allocation2] sm:$0xff]  ;;  %v1059_v29 = vpack.c.bf16 %v345_v25, %v342_v24  ;;  %v348_v30 = vld [vmem:[#allocation11 + $0x60] sm:$0xff]  ;;  %v351_v31 = vld [vmem:[#allocation11 + $0x78] sm:$0xff]  ;;  %v1061_v32 = vpack.c.bf16 %v352_v27, %v349_v26 }
  0x94   :  { %1018 = vmatprep.subr.bf16.mxu0 %v1017_v50  ;;  %v335_v33 = vld [vmem:[#allocation8 + $0x10] sm:$0xff]  ;;  %v338_v34 = vld [vmem:[#allocation11 + $0x10] sm:$0xff]  ;;  %v341_v35 = vld [vmem:[#allocation11 + $0x28] sm:$0xff]  ;;  %v1063_v38 = vpack.c.bf16 %v351_v31, %v348_v30 }
  0x95   :  { %v355_v36 = vld [vmem:[#allocation11 + $0x98] sm:$0xff]  ;;  %v358_v37 = vld [vmem:[#allocation11 + $0xb0] sm:$0xff]  ;;  %v1086_v40 = vpack.c.bf16 %v341_v35, %v338_v34  ;;  %v357_v42 = vld [vmem:[#allocation11 + $0xa8] sm:$0xff] }
  0x96   :  { %1046 = vmatpush3.bf16.msra.mxu1 %v1045_v56  ;;  %v354_v39 = vld [vmem:[#allocation11 + $0x90] sm:$0xff]  ;;  %v1065_v41 = vpack.c.bf16 %v358_v37, %v355_v36  ;;  %v344_v43 = vld [vmem:[#allocation11 + $0x40] sm:$0xff]  ;;  %v347_v44 = vld [vmem:[#allocation11 + $0x58] sm:$0xff] }
  0x97   :  { %1020 = vmatpush1.bf16.msra.mxu0 %v1019_v57  ;;  %1047 = vmatprep.subr.bf16.mxu1 %v1386_v0  ;;  %v361_v45 = vld [vmem:[#allocation11 + $0xc8] sm:$0xff]  ;;  %v364_v46 = vld [vmem:[#allocation11 + $0xe0] sm:$0xff]  ;;  %v1067_v47 = vpack.c.bf16 %v357_v42, %v354_v39  ;;  %v1089_v49 = vpack.c.bf16 %v347_v44, %v344_v43  ;;  %v363_v51 = vld [vmem:[#allocation11 + $0xd8] sm:$0xff] }
  0x98   :  { %1022 = vmatprep.subr.bf16.mxu0 %v1021_v59  ;;  %v360_v48 = vld [vmem:[#allocation11 + $0xc0] sm:$0xff]  ;;  %v1069_v50 = vpack.c.bf16 %v364_v46, %v361_v45  ;;  %v350_v52 = vld [vmem:[#allocation11 + $0x70] sm:$0xff]  ;;  %v353_v53 = vld [vmem:[#allocation11 + $0x88] sm:$0xff] }
  0x99   :  { %v367_v54 = vld [vmem:[#allocation11 + $0xf8] sm:$0xff]  ;;  %v370_v55 = vld [vmem:[#allocation11 + $0x110] sm:$0xff]  ;;  %v1071_v56 = vpack.c.bf16 %v363_v51, %v360_v48  ;;  %v1092_v58 = vpack.c.bf16 %v353_v53, %v350_v52  ;;  %v369_v60 = vld [vmem:[#allocation11 + $0x108] sm:$0xff]  ;;  %v177_v51 = vlaneseq }
  0x9a   :  { %1049 = vmatpush3.bf16.msra.mxu1 %v1048_v3  ;;  %v366_v57 = vld [vmem:[#allocation11 + $0xf0] sm:$0xff]  ;;  %v1073_v59 = vpack.c.bf16 %v370_v55, %v367_v54  ;;  %v356_v61 = vld [vmem:[#allocation11 + $0xa0] sm:$0xff]  ;;  %v359_v62 = vld [vmem:[#allocation11 + $0xb8] sm:$0xff] }
  0x9b   :  { %1024 = vmatpush1.bf16.msra.mxu0 %v1023_v4  ;;  %1050 = vmatprep.subr.bf16.mxu1 %v1386_v0  ;;  %v373_v63 = vld [vmem:[#allocation11 + $0x128] sm:$0xff]  ;;  %v376_v2 = vld [vmem:[#allocation11 + $0x140] sm:$0xff]  ;;  %v1075_v3 = vpack.c.bf16 %v369_v60, %v366_v57  ;;  %v1095_v5 = vpack.c.bf16 %v359_v62, %v356_v61  ;;  %v375_v7 = vld [vmem:[#allocation11 + $0x138] sm:$0xff]  ;;  %v178_v52 = vshrl.u32 %v177_v51, 7 }
  0x9c   :  { %1026 = vmatprep.subr.bf16.mxu0 %v1025_v6  ;;  %v372_v4 = vld [vmem:[#allocation11 + $0x120] sm:$0xff]  ;;  %v1077_v6 = vpack.c.bf16 %v376_v2, %v373_v63  ;;  %v362_v8 = vld [vmem:[#allocation11 + $0xd0] sm:$0xff]  ;;  %v365_v9 = vld [vmem:[#allocation11 + $0xe8] sm:$0xff] }
  0x9d   :  { %v379_v10 = vld [vmem:[#allocation11 + $0x158] sm:$0xff]  ;;  %v382_v11 = vld [vmem:[#allocation11 + $0x170] sm:$0xff]  ;;  %v381_v16 = vld [vmem:[#allocation11 + $0x168] sm:$0xff]  ;;  %v179_v53 = vsub.s32 0, %v178_v52  ;;  %v183_v55 = vsub.s32 1, %v178_v52  ;;  %v187_v57 = vsub.s32 2, %v178_v52 }
  0x9e   :  { %1052 = vmatpush3.bf16.msra.mxu1 %v1051_v12  ;;  %v1079_v12 = vpack.c.bf16 %v375_v7, %v372_v4  ;;  %v1081_v15 = vpack.c.bf16 %v382_v11, %v379_v10  ;;  %v371_v18 = vld [vmem:[#allocation11 + $0x118] sm:$0xff]  ;;  %v380_v25 = vld [vmem:[#allocation11 + $0x160] sm:$0xff]  ;;  %v387_v31 = vld [vmem:[#allocation13 + $0x10] sm:$0xff] }
  0x9f   :  { %1028 = vmatpush1.bf16.msra.mxu0 %v1027_v13  ;;  %408 = vmatprep.subr.mxu1 %v334_v17  ;;  %v378_v13 = vld [vmem:[#allocation11 + $0x150] sm:$0xff]  ;;  %v368_v17 = vld [vmem:[#allocation11 + $0x100] sm:$0xff]  ;;  %v383_v26 = vld [vmem:[#allocation11 + $0x178] sm:$0xff] }
  0xa0   :  { %1054 = vmatprep.subr.bf16.mxu0 %v1053_v14  ;;  %v1098_v14 = vpack.c.bf16 %v365_v9, %v362_v8  ;;  %v1083_v19 = vpack.c.bf16 %v381_v16, %v378_v13  ;;  %v1107_v27 = vpack.c.bf16 %v383_v26, %v380_v25  ;;  %v389_v34 = vld [vmem:[#allocation13 + $0x20] sm:$0xff]  ;;  %v390_v35 = vld [vmem:[#allocation13 + $0x28] sm:$0xff]  ;;  %v391_v36 = vld [vmem:[#allocation13 + $0x30] sm:$0xff] }
  0xa1   :  { %920 = vmatmul.mubr.f32.vlgmr.msra.gmra.mrb[0].mxu1 %v126_v20  ;;  %v392_v37 = vld [vmem:[#allocation13 + $0x38] sm:$0xff]  ;;  %v393_v39 = vld [vmem:[#allocation13 + $0x40] sm:$0xff]  ;;  %v395_v42 = vld [vmem:[#allocation13 + $0x50] sm:$0xff] }
  0xa2   :  { %257 = vmatmul.mubr.f32.vlgmr.msra.gmra.mrb[0].mxu0 %v126_v20  ;;  %409 = vmatpush1.msra.mxu1 %v333_v22  ;;  %v1101_v20 = vpack.c.bf16 %v371_v18, %v368_v17  ;;  %v377_v22 = vld [vmem:[#allocation11 + $0x148] sm:$0xff]  ;;  %v396_v43 = vld [vmem:[#allocation13 + $0x58] sm:$0xff]  ;;  %v397_v45 = vld [vmem:[#allocation13 + $0x60] sm:$0xff] }
  0xa3   :  { %1056 = vmatpush1.bf16.msra.mxu0 %v1055_v21  ;;  %472 = vmatprep.mubr.f32.mxu1 %v1388_v1  ;;  %v374_v21 = vld [vmem:[#allocation11 + $0x130] sm:$0xff]  ;;  %v1125_v44 = vpack.c.bf16 %v396_v43, %v395_v42  ;;  %v398_v46 = vld [vmem:[#allocation13 + $0x68] sm:$0xff] }
  0xa4   :  { %1058 = vmatprep.subr.bf16.mxu0 %v1057_v23  ;;  %922 = vmatprep.subr.mxu1 %v1388_v1  ;;  %v1574_v23 = vld [vmem:[#allocation7] sm:$0xff]  ;;  %v1104_v24 = vpack.c.bf16 %v377_v22, %v374_v21  ;;  %v399_v48 = vld [vmem:[#allocation13 + $0x70] sm:$0xff] }
  0xa5   :  { %613 = vmatprep.mubr.f32.mxu0 %v1388_v1  ;;  %828 = vmatmul.mubr.msk.f32.vlgmr.msra.gmra.mrb[2].mxu1 %vm404_vm1, %v403_v28  ;;  %v175_v54 = vld [vmem:[%s1630_s6] sm:$0x7] }
  0xa6   :  { %923 = vmatpush3.msra.mxu1 %v335_v33  ;;  %924 = vmatprep.mubr.msk.f32.mxu1 %vm1387_vm0, %v1388_v1  ;;  %v188_v63 = vrot.slane %v175_v54, %v187_v57  ;;  %v832_v22 = vld [vmem:[%s1631_s7] ss:$0 sm:$0xff]  ;;  %s1319_s7 = scalar_lea.vmem %s813_s22, 128 }
  0xa7   :  { %1060 = vmatpush1.bf16.msra.mxu0 %v1059_v29  ;;  %1085 = vmatprep.subr.bf16.mxu1 %v1386_v0  ;;  %v386_v29 = vld [vmem:[#allocation13 + $0x8] sm:$0xff]  ;;  %p1320_p0 = scmp.ne.s32.totalorder %s813_s22, %s1319_s7  ;;  %p1325_p2 = scmp.lt.s32.totalorder %s1319_s7, %s1319_s7 }
  0xa8   :  { %1062 = vmatprep.subr.bf16.mxu0 %v1061_v32  ;;  %v388_v32 = vld [vmem:[#allocation13 + $0x18] sm:$0xff] }
  0xa9   :  { %925 = vmatmul.mubr.msk.f32.vlgmr.msra.gmra.mrb[4].mxu1 %vm404_vm1, %v403_v28  ;;  %v385_v28 = vld [vmem:[#allocation13] sm:$0xff]  ;;  %v1113_v33 = vpack.c.bf16 %v388_v32, %v387_v31  ;;  %p1326_p3 = por %p1325_p2, %p1324_p1 }
  0xaa   :  { %1087 = vmatpush3.bf16.msra.mxu1 %v1086_v40  ;;  %959 = vmatprep.mubr.msk.f32.mxu1 %vm1387_vm0, %v1388_v1  ;;  %v1110_v30 = vpack.c.bf16 %v386_v29, %v385_v28  ;;  %v394_v40 = vld [vmem:[#allocation13 + $0x48] sm:$0xff] }
  0xab   :  { %1064 = vmatpush1.bf16.msra.mxu0 %v1063_v38  ;;  %1088 = vmatprep.subr.bf16.mxu1 %v1386_v0  ;;  %v1119_v38 = vpack.c.bf16 %v392_v37, %v391_v36  ;;  %p1327_p4 = pnand %p1326_p3, %p1320_p0 }
  0xac   :  { %1066 = vmatprep.subr.bf16.mxu0 %v1065_v41  ;;  %v1122_v41 = vpack.c.bf16 %v394_v40, %v393_v39 }
  0xae   :  { %1090 = vmatpush3.bf16.msra.mxu1 %v1089_v49  ;;  %v400_v49 = vld [vmem:[#allocation13 + $0x78] sm:$0xff] }
  0xaf   :  { %1068 = vmatpush1.bf16.msra.mxu0 %v1067_v47  ;;  %1091 = vmatprep.subr.bf16.mxu1 %v1386_v0  ;;  %v1128_v47 = vpack.c.bf16 %v398_v46, %v397_v45 }
  0xb0   :  { %1070 = vmatprep.subr.bf16.mxu0 %v1069_v50  ;;  %v1131_v50 = vpack.c.bf16 %v400_v49, %v399_v48 }
  0xb2   :  { %1093 = vmatpush3.bf16.msra.mxu1 %v1092_v58  ;;  %v184_v58 = vrot.slane %v175_v54, %v183_v55 }
  0xb3   :  { %1072 = vmatpush1.bf16.msra.mxu0 %v1071_v56  ;;  %1094 = vmatprep.subr.bf16.mxu1 %v1386_v0  ;;  %v180_v56 = vrot.slane %v175_v54, %v179_v53 }
  0xb4   :  { %1074 = vmatprep.subr.bf16.mxu0 %v1073_v59 }
  0xb6   :  { %1096 = vmatpush3.bf16.msra.mxu1 %v1095_v5 }
  0xb7   :  { %1076 = vmatpush1.bf16.msra.mxu0 %v1075_v3  ;;  %1097 = vmatprep.subr.bf16.mxu1 %v1386_v0 }
  0xb8   :  { %1078 = vmatprep.subr.bf16.mxu0 %v1077_v6 }
  0xba   :  { %1099 = vmatpush3.bf16.msra.mxu1 %v1098_v14 }
  0xbb   :  { %1080 = vmatpush1.bf16.msra.mxu0 %v1079_v12  ;;  %1100 = vmatprep.subr.bf16.mxu1 %v1386_v0 }
  0xbc   :  { %1082 = vmatprep.subr.bf16.mxu0 %v1081_v15 }
  0xbe   :  { %1102 = vmatpush3.bf16.msra.mxu1 %v1101_v20 }
  0xbf   :  { %1084 = vmatpush1.bf16.msra.mxu0 %v1083_v19  ;;  %1103 = vmatprep.subr.bf16.mxu1 %v1386_v0 }
  0xc0   :  { %1109 = vmatprep.subr.bf16.mxu0 %v1386_v0 }
  0xc2   :  { %614 = vmatmul.mubr.f32.vlgmr.msra.gmra.mrb[2].mxu0 %v1574_v23  ;;  %1105 = vmatpush3.bf16.msra.mxu1 %v1104_v24 }
  0xc3   :  { %994 = vmatprep.mubr.msk.f32.mxu0 %vm1387_vm0, %v1388_v1  ;;  %1106 = vmatprep.subr.bf16.mxu1 %v1386_v0  ;;  %v1116_v1 = vpack.c.bf16 %v390_v35, %v389_v34 }
  0xc4   :  { %1111 = vmatpush3.bf16.msra.mxu0 %v1110_v30 }
  0xc5   :  { %1112 = vmatprep.subr.bf16.mxu0 %v1386_v0 }
  0xc6   :  { %1108 = vmatpush3.bf16.msra.mxu1 %v1107_v27 }
  0xc8   :  { %1114 = vmatpush3.bf16.msra.mxu0 %v1113_v33 }
  0xc9   :  { %960 = vmatmul.mubr.f32.vlgmr.msra.gmra.mrb[6].mxu1 %v1574_v23  ;;  %1115 = vmatprep.subr.bf16.mxu0 %v1386_v0 }
  0xcc   :  { %1117 = vmatpush3.bf16.msra.mxu0 %v1116_v1 }
  0xcd   :  { %1118 = vmatprep.subr.bf16.mxu0 %v1386_v0 }
  0xd0   :  { %1120 = vmatpush3.bf16.msra.mxu0 %v1119_v38 }
  0xd1   :  { %1121 = vmatprep.subr.bf16.mxu0 %v1386_v0 }
  0xd4   :  { %1123 = vmatpush3.bf16.msra.mxu0 %v1122_v41 }
  0xd5   :  { %1124 = vmatprep.subr.bf16.mxu0 %v1386_v0 }
  0xd8   :  { %1126 = vmatpush3.bf16.msra.mxu0 %v1125_v44 }
  0xd9   :  { %1127 = vmatprep.subr.bf16.mxu0 %v1386_v0 }
  0xdc   :  { %1129 = vmatpush3.bf16.msra.mxu0 %v1128_v47 }
  0xdd   :  { %1130 = vmatprep.subr.bf16.mxu0 %v1386_v0 }
  0xe0   :  { %1132 = vmatpush3.bf16.msra.mxu0 %v1131_v50 }
 0x174   :  { %v329_v60 = vpop.f32.mrb[0].mxu1 }
 0x175   :  { %v258_v59 = vpop.f32.mrb[0].mxu0  ;;  %v921_v2 = vpop.f32.mrb[1].mxu1  ;;  %v330_v4 = vadd.f32 %v329_v60, %v188_v63 }
 0x176   :  { %v259_v61 = vadd.f32 %v258_v59, %v180_v56  ;;  %v260_v62 = vpop.f32.mrb[1].mxu0 }
 0x177   :  { %v261_v3 = vadd.f32 %v260_v62, %v184_v58 }
 0x178   :  { %v474_v0 = vpop.f32.mrb[2].mxu1 }
 0x179   :  { %v475_v5 = vadd.f32 %v474_v0, %v259_v61  ;;  %v476_v6 = vpop.f32.mrb[3].mxu1 }
 0x17a   :  { %v477_v7 = vadd.f32 %v476_v6, %v261_v3 }
 0x17c   :  { %v545_v8 = vpop.f32.mrb[4].mxu1 }
 0x17d   :  { %v546_v9 = vadd.f32 %v545_v8, %v330_v4  ;;  %v926_v10 = vpop.f32.mrb[5].mxu1 }
 0x195   :  { %v615_v11 = vpop.f32.mrb[2].mxu0 }
 0x196   :  { %v690_v12 = vadd.f32 %v615_v11, %v475_v5  ;;  %v617_v13 = vpop.f32.mrb[3].mxu0 }
 0x197   :  { %v697_v14 = vadd.f32 %v617_v13, %v477_v7 }
 0x198   :  { %v830_v15 = vmul.f32 -1.442695, %v690_v12 }
 0x199   :  { %v831_v16 = vmul.f32 -1.442695, %v697_v14 }
 0x19a   :  { %1155 = vpow2.f32 %v830_v15 }
 0x19b   :  { %1157 = vpow2.f32 %v831_v16 }
 0x19c   :  { %v686_v17 = vpop.f32.mrb[6].mxu1 }
 0x19d   :  { %v961_v18 = vpop.f32.mrb[7].mxu1  ;;  %v710_v25 = vadd.f32 %v832_v22, %v686_v17 }
 0x1a4   :  { %v1156_v19 = vpop.eup %1155 }
 0x1a5   :  { %v694_v20 = vadd.f32 1.0, %v1156_v19  ;;  %v1158_v21 = vpop.eup %1157 }
 0x1a6   :  { %v701_v24 = vadd.f32 1.0, %v1158_v21 }
 0x1a7   :  { %1159 = vrcp.f32 %v694_v20 }
 0x1a8   :  { %1161 = vrcp.f32 %v701_v24 }
 0x1b1   :  { %v1160_v26 = vpop.eup %1159 }
 0x1b2   :  { %v711_v27 = vmul.f32 %v1160_v26, %v710_v25  ;;  %v1162_v29 = vpop.eup %1161 }
 0x1b3   :  { %v714_v30 = vsub.f32 1.0, %v1162_v29  ;;  %v716_v33 = vmul.f32 %v1162_v29, %v1574_v23 }
 0x1b4   :  { %v712_v28 = vadd.f32 %v711_v27, %v546_v9 }
 0x1b6   :  { %1163 = vtanh.f32 %v712_v28 }
 0x1c0   :  { %v1164_v31 = vpop.eup %1163 }
 0x1c1   :  { %v715_v32 = vmul.f32 %v1164_v31, %v714_v30 }
 0x1c3   :  { %v717_v34 = vadd.f32 %v716_v33, %v715_v32 }
 0x1c5   :  { %995 = vmatmul.mubr.f32.vlgmr.msra.gmra.mrb[4].mxu0 %v717_v34  ;;  %795 = vst [vmem:[#allocation15] sm:$0xff] %v717_v34 }
 0x1c6   :  { %1330 = shalt.err (!%p1327_p4)
}
 0x1c7   :  { %s1331_s5 = scalar_lea.hbm %s1635_s11, 128 }
 0x1c8   :  { %p1332_p5 = scmp.ne.s32.totalorder %s1635_s11, %s1331_s5  ;;  %p1335_p6 = scmp.lt.u32.totalorder %s1331_s5, %s1635_s11 }
 0x1ca   :  { %p1337_p7 = pnand %p1335_p6, %p1332_p5 }
 0x1cc   :  { %1340 = shalt.err (!%p1337_p7)
}
 0x1cd   :  { %815 = dma.vmem_to_hbm [thread:$0]  %s813_s22, 128, %s1635_s11, [#allocation16]   ;;  %v833_v23 = vld [vmem:[%s1633_s9] ss:$0 sm:$0xff] }
 0x1ce   :  { %s1390_s15 = smov [#allocation14]  }
 0x1cf   :  { %s802_s16 = sshll.u32 %s1390_s15, 4  ;;  %s803_s16 = int_to_ptr.vmem [resolvable:$true] %s802_s16 }
 0x1d0   :  { %s1341_s17 = scalar_lea.vmem %s803_s16, 128  ;;  %p1346_p9 = scmp.lt.s32.totalorder %s803_s16, %s803_s16 }
 0x1d1   :  { %p1342_p8 = scmp.ne.s32.totalorder %s803_s16, %s1341_s17  ;;  %p1347_p10 = scmp.lt.s32.totalorder %s1341_s17, %s1341_s17 }
 0x1d3   :  { %p1348_p11 = por %p1347_p10, %p1346_p9 }
 0x1d5   :  { %p1349_p12 = pnand %p1348_p11, %p1342_p8 }
 0x298   :  { %v790_v35 = vpop.f32.mrb[4].mxu0 }
 0x299   :  { %v791_v1 = vadd.f32 %v833_v23, %v790_v35  ;;  %v996_v36 = vpop.f32.mrb[5].mxu0 }
 0x29b   :  { %794 = vst [vmem:[#allocation14] sm:$0xff] %v791_v1 }
 0x29c   :  { %1352 = shalt.err (!%p1349_p12)
}
 0x29d   :  { %s1353_s0 = scalar_lea.hbm %s1634_s10, 128 }
 0x29e   :  { %p1354_p13 = scmp.ne.s32.totalorder %s1634_s10, %s1353_s0  ;;  %p1357_p0 = scmp.lt.u32.totalorder %s1353_s0, %s1634_s10 }
 0x2a0   :  { %p1359_p1 = pnand %p1357_p0, %p1354_p13 }
 0x2a2   :  { %1362 = shalt.err (!%p1359_p1)
}
 0x2a3   :  { %805 = dma.vmem_to_hbm [thread:$0]  %s803_s16, 128, %s1634_s10, [#allocation4]  }
 0x2a4   :  { %1371 = dma.done.wait [#allocation4], 128  }
 0x2a5   :  { %1372 = vsyncadd [#allocation4], 4294967168 }
 0x2a6   :  { %1373 = dma.done.wait [#allocation16], 128  }
 0x2a7   :  { %1374 = vsyncadd [#allocation16], 4294967168 }
 0x2a8   :  { %822 = vsyncpa [#allocation3], 1 }
 0x2a9   :  { %823 = vsyncpa [#allocation6], 1 }
 0x2aa   :  { %824 = vsyncpa [#allocation9], 1 }
 0x2ab   :  { %825 = vsyncpa [#allocation12], 1 }
 0x2ac   :  { %826 = vsyncpa [#allocation4], 1 }
 0x2ad   :  { %827 = vsyncpa [#allocation16], 1 }

</bundles_post_ra>
